<compile_context>
chip_gen: v6e
topology: v6e:2x2x1
jax: 0.10.0
libtpu: 0.0.40
codegen_flags: <defaults>
</compile_context>

<pallas_src>
import functools

import jax
import jax.numpy as jnp
from jax.experimental import pallas as pl
from jax.experimental.pallas import tpu as pltpu

LANE = 128
TM = 128                 # output row tile (MXU-native M)
_NEG_BIG = -1e30         # finite "minus infinity" for padded class lanes


def _round_up(n, m):
    return (n + m - 1) // m * m


# ----------------------------- Pallas kernel -------------------------------


def _sagenet_fused_kernel(x_ref, a0_ref, a1_ref, ws1_ref, wn1_ref, b1_ref,
                          ws2_ref, wn2_ref, b2_ref, o_ref, h_ref, *,
                          res0_pad: int, tm: int):
    """conv1 -> relu -> (eval dropout) -> conv2 -> log_softmax, all in VMEM.

    One grid step produces one [tm, C_pad] tile of the final output; the
    layer-1 hidden activations never leave VMEM.
    """
    x = x_ref[...]                                         # bf16 [n_src_p, F_p]

    # ---- layer 1: mean aggregation + two accumulating dots + bias + relu
    agg0 = jnp.dot(a0_ref[...], x, preferred_element_type=jnp.float32)
    h = (jnp.dot(x[:res0_pad, :], ws1_ref[...],
                 preferred_element_type=jnp.float32)
         + jnp.dot(agg0.astype(jnp.bfloat16), wn1_ref[...],
                   preferred_element_type=jnp.float32)
         + b1_ref[...])
    # relu; dropout(p=0.5) is eval-mode identity.
    h_ref[...] = jnp.maximum(h, 0.0).astype(jnp.bfloat16)  # bf16 for layer-2 MXU

    # ---- layer 2 on this output row tile: mean agg + two dots + bias
    agg1 = jnp.dot(a1_ref[...], h_ref[...],
                   preferred_element_type=jnp.float32)
    row0 = pl.multiple_of(pl.program_id(0) * tm, tm)
    h_self = h_ref[pl.ds(row0, tm), :]                     # block-1 target rows
    logits = (jnp.dot(h_self, ws2_ref[...],
                      preferred_element_type=jnp.float32)
              + jnp.dot(agg1.astype(jnp.bfloat16), wn2_ref[...],
                        preferred_element_type=jnp.float32)
              + b2_ref[...])        # padded class lanes carry bias -1e30

    # ---- log_softmax over the lane-padded (128-wide) class axis, f32
    m = jnp.max(logits, axis=1, keepdims=True)
    s = logits - m
    lse = jnp.log(jnp.sum(jnp.exp(s), axis=1, keepdims=True))
    o_ref[...] = (s - lse).astype(o_ref.dtype)


# ------------------------------ JAX wrappers --------------------------------


def _mean_adjacency(edge_index, res_size, n_src):
    """Dense row-normalized adjacency (mean aggregation as a matmul). Glue."""
    src = edge_index[0].astype(jnp.int32)
    dst = edge_index[1].astype(jnp.int32)
    a = jnp.zeros((res_size, n_src), jnp.float32).at[dst, src].add(1.0)
    deg = jnp.maximum(jnp.sum(a, axis=1, keepdims=True), 1.0)
    return a / deg


def _pad2(a, rows, cols, dtype, fill=0.0):
    """Zero-(or fill-)pad a 2-D array to [rows, cols] and cast."""
    out = jnp.full((rows, cols), fill, jnp.float32)
    out = out.at[:a.shape[0], :a.shape[1]].set(a.astype(jnp.float32))
    return out.astype(dtype)


def sagenet_forward(params, x, data_flow):
    """data_flow = [(res_size0, edge_index0), (res_size1, edge_index1)]"""
    res0, ei0 = data_flow[0]
    res1, ei1 = data_flow[1]
    n_src, f_in = x.shape
    n_hidden = params["w_self1"].shape[1]
    n_classes = params["w_self2"].shape[1]

    # Host-side glue: normalized adjacencies + padding to MXU-native shapes.
    a0 = _mean_adjacency(ei0, res0, n_src)                 # [res0, n_src]
    a1 = _mean_adjacency(ei1, res1, res0)                  # [res1, res0]

    n_src_p = _round_up(n_src, LANE)
    res0_p = _round_up(res0, LANE)
    res1_p = _round_up(res1, TM)
    f_p = _round_up(f_in, LANE)
    h_p = _round_up(n_hidden, LANE)
    c_p = _round_up(n_classes, LANE)

    # bf16 MXU inputs; f32 biases (accumulation stays f32 inside the kernel).
    x_p = _pad2(x, n_src_p, f_p, jnp.bfloat16)
    a0_p = _pad2(a0, res0_p, n_src_p, jnp.bfloat16)
    a1_p = _pad2(a1, res1_p, res0_p, jnp.bfloat16)
    ws1 = _pad2(params["w_self1"], f_p, h_p, jnp.bfloat16)
    wn1 = _pad2(params["w_neigh1"], f_p, h_p, jnp.bfloat16)
    ws2 = _pad2(params["w_self2"], h_p, c_p, jnp.bfloat16)
    wn2 = _pad2(params["w_neigh2"], h_p, c_p, jnp.bfloat16)
    b1 = _pad2(params["b1"][None, :], 1, h_p, jnp.float32)
    b2 = _pad2(params["b2"][None, :], 1, c_p, jnp.float32, fill=_NEG_BIG)

    num_tiles = res1_p // TM
    resident = lambda i: (0, 0)        # DMA'd once, stays in VMEM across steps

    kernel = functools.partial(_sagenet_fused_kernel, res0_pad=res0_p, tm=TM)
    out_p = pl.pallas_call(
        kernel,
        out_shape=jax.ShapeDtypeStruct((res1_p, c_p), jnp.float32),
        grid_spec=pltpu.PrefetchScalarGridSpec(
            num_scalar_prefetch=0,
            grid=(num_tiles,),
            in_specs=[
                pl.BlockSpec((n_src_p, f_p), resident),        # x        (res.)
                pl.BlockSpec((res0_p, n_src_p), resident),     # A0       (res.)
                pl.BlockSpec((TM, res0_p), lambda i: (i, 0)),  # A1 tile  (stream)
                pl.BlockSpec((f_p, h_p), resident),            # W_self1  (res.)
                pl.BlockSpec((f_p, h_p), resident),            # W_neigh1 (res.)
                pl.BlockSpec((1, h_p), resident),              # b1       (res.)
                pl.BlockSpec((h_p, c_p), resident),            # W_self2  (res.)
                pl.BlockSpec((h_p, c_p), resident),            # W_neigh2 (res.)
                pl.BlockSpec((1, c_p), resident),              # b2       (res.)
            ],
            out_specs=pl.BlockSpec((TM, c_p), lambda i: (i, 0)),
            scratch_shapes=[pltpu.VMEM((res0_p, h_p), jnp.bfloat16)],  # h
        ),
        compiler_params=pltpu.CompilerParams(
            dimension_semantics=("parallel",),          # uses both TCs on v7x
            vmem_limit_bytes=48 * 1024 * 1024,          # < 64 MiB v7x physical
        ),
    )(x_p, a0_p, a1_p, ws1, wn1, b1, ws2, wn2, b2)

    return out_p[:res1, :n_classes]


def init_params(key, n_node_ftrs, n_classes, n_hidden):
    ks = jax.random.split(key, 6)

    def glorot(k, shape):
        fan_in, fan_out = shape
        lim = (6.0 / (fan_in + fan_out)) ** 0.5
        return jax.random.uniform(k, shape, jnp.float32, -lim, lim)

    return {
        "w_self1": glorot(ks[0], (n_node_ftrs, n_hidden)),
        "w_neigh1": glorot(ks[1], (n_node_ftrs, n_hidden)),
        "b1": jnp.zeros((n_hidden,), jnp.float32),
        "w_self2": glorot(ks[2], (n_hidden, n_classes)),
        "w_neigh2": glorot(ks[3], (n_hidden, n_classes)),
        "b2": jnp.zeros((n_classes,), jnp.float32),
    }


# ---------------------------------- main -------------------------------------

if __name__ == "__main__":
    # Small shapes consistent with the module's forward.
    N_SRC0 = 24      # source nodes of first data-flow block
    RES0 = 16        # targets of block 0 == sources of block 1
    RES1 = 8         # targets of block 1 (rows of final output)
    F_IN = 16        # n_node_ftrs
    HIDDEN = 32      # n_hidden
    CLASSES = 8      # n_classes
    E0, E1 = 64, 32  # edge counts per block

    key = jax.random.PRNGKey(0)
    kx, ke0s, ke0d, ke1s, ke1d, kp = jax.random.split(key, 6)

    x = jax.random.normal(kx, (N_SRC0, F_IN), jnp.float32)

    edge_index0 = jnp.stack([
        jax.random.randint(ke0s, (E0,), 0, N_SRC0, jnp.int32),   # sources
        jax.random.randint(ke0d, (E0,), 0, RES0, jnp.int32),     # targets
    ])
    edge_index1 = jnp.stack([
        jax.random.randint(ke1s, (E1,), 0, RES0, jnp.int32),
        jax.random.randint(ke1d, (E1,), 0, RES1, jnp.int32),
    ])
    data_flow = [(RES0, edge_index0), (RES1, edge_index1)]

    params = init_params(jax.random.PRNGKey(42), F_IN, CLASSES, HIDDEN)

    out = sagenet_forward(params, x, data_flow)
    out = jax.block_until_ready(out)

    assert out.shape == (RES1, CLASSES)
    # each row of log_softmax must (log-)sum to ~0
    row_sums = jnp.sum(jnp.exp(out), axis=1)
    assert jnp.allclose(row_sums, 1.0, atol=1e-4)
    assert bool(jnp.all(jnp.isfinite(out)))

    print("KERNEL_OK")
</pallas_src>

<mosaic_0001>
module attributes {stable_mosaic.version = 11 : i64} {
  func.func @_sagenet_fused_kernel(%arg0: i32, %arg1: memref<128x128xbf16, #tpu.memory_space<vmem>>, %arg2: memref<128x128xbf16, #tpu.memory_space<vmem>>, %arg3: memref<128x128xbf16, #tpu.memory_space<vmem>>, %arg4: memref<128x128xbf16, #tpu.memory_space<vmem>>, %arg5: memref<128x128xbf16, #tpu.memory_space<vmem>>, %arg6: memref<1x128xf32, #tpu.memory_space<vmem>>, %arg7: memref<128x128xbf16, #tpu.memory_space<vmem>>, %arg8: memref<128x128xbf16, #tpu.memory_space<vmem>>, %arg9: memref<1x128xf32, #tpu.memory_space<vmem>>, %arg10: memref<128x128xf32, #tpu.memory_space<vmem>>, %arg11: memref<128x128xbf16, #tpu.memory_space<vmem>>) attributes {dimension_semantics = [#tpu.dimension_semantics<parallel>], iteration_bounds = array<i64: 1>, scalar_prefetch = 0 : i64, scratch_operands = 1 : i64, tpu.core_type = #tpu.core_type<tc>, window_params = [{pipeline_mode = #tpu.pipeline_mode<synchronous>, transform_indices = @transform_0, window_bounds = array<i64: 128, 128>}, {pipeline_mode = #tpu.pipeline_mode<synchronous>, transform_indices = @transform_1, window_bounds = array<i64: 128, 128>}, {transform_indices = @transform_2, window_bounds = array<i64: 128, 128>}, {pipeline_mode = #tpu.pipeline_mode<synchronous>, transform_indices = @transform_3, window_bounds = array<i64: 128, 128>}, {pipeline_mode = #tpu.pipeline_mode<synchronous>, transform_indices = @transform_4, window_bounds = array<i64: 128, 128>}, {pipeline_mode = #tpu.pipeline_mode<synchronous>, transform_indices = @transform_5, window_bounds = array<i64: 1, 128>}, {pipeline_mode = #tpu.pipeline_mode<synchronous>, transform_indices = @transform_6, window_bounds = array<i64: 128, 128>}, {pipeline_mode = #tpu.pipeline_mode<synchronous>, transform_indices = @transform_7, window_bounds = array<i64: 128, 128>}, {pipeline_mode = #tpu.pipeline_mode<synchronous>, transform_indices = @transform_8, window_bounds = array<i64: 1, 128>}, {transform_indices = @transform_9, window_bounds = array<i64: 128, 128>}]} {
    %c0 = arith.constant 0 : index
    %c0_0 = arith.constant 0 : index
    %0 = vector.load %arg1[%c0, %c0_0] : memref<128x128xbf16, #tpu.memory_space<vmem>>, vector<128x128xbf16>
    %c0_1 = arith.constant 0 : index
    %c0_2 = arith.constant 0 : index
    %1 = vector.load %arg2[%c0_1, %c0_2] : memref<128x128xbf16, #tpu.memory_space<vmem>>, vector<128x128xbf16>
    %cst = arith.constant dense<0.000000e+00> : vector<128x128xf32>
    %2 = tpu.matmul %1, %0, %cst {dimension_numbers = #tpu.dot_dimension_numbers<[1], [0], [0], [1], [0, 0, 1, 1], [], []>} : vector<128x128xbf16>, vector<128x128xbf16>, vector<128x128xf32> -> vector<128x128xf32>
    %c0_3 = arith.constant 0 : index
    %c0_4 = arith.constant 0 : index
    %3 = vector.load %arg4[%c0_3, %c0_4] : memref<128x128xbf16, #tpu.memory_space<vmem>>, vector<128x128xbf16>
    %cst_5 = arith.constant dense<0.000000e+00> : vector<128x128xf32>
    %4 = tpu.matmul %0, %3, %cst_5 {dimension_numbers = #tpu.dot_dimension_numbers<[1], [0], [0], [1], [0, 0, 1, 1], [], []>} : vector<128x128xbf16>, vector<128x128xbf16>, vector<128x128xf32> -> vector<128x128xf32>
    %5 = arith.truncf %2 : vector<128x128xf32> to vector<128x128xbf16>
    %c0_6 = arith.constant 0 : index
    %c0_7 = arith.constant 0 : index
    %6 = vector.load %arg5[%c0_6, %c0_7] : memref<128x128xbf16, #tpu.memory_space<vmem>>, vector<128x128xbf16>
    %cst_8 = arith.constant dense<0.000000e+00> : vector<128x128xf32>
    %7 = tpu.matmul %5, %6, %cst_8 {dimension_numbers = #tpu.dot_dimension_numbers<[1], [0], [0], [1], [0, 0, 1, 1], [], []>} : vector<128x128xbf16>, vector<128x128xbf16>, vector<128x128xf32> -> vector<128x128xf32>
    %8 = arith.addf %4, %7 : vector<128x128xf32>
    %c0_9 = arith.constant 0 : index
    %c0_10 = arith.constant 0 : index
    %9 = vector.load %arg6[%c0_9, %c0_10] : memref<1x128xf32, #tpu.memory_space<vmem>>, vector<1x128xf32>
    %10 = vector.broadcast %9 : vector<1x128xf32> to vector<128x128xf32>
    %11 = arith.addf %8, %10 : vector<128x128xf32>
    %cst_11 = arith.constant 0.000000e+00 : f32
    %12 = vector.broadcast %cst_11 : f32 to vector<128x128xf32>
    %13 = arith.maximumf %11, %12 : vector<128x128xf32>
    %14 = arith.truncf %13 : vector<128x128xf32> to vector<128x128xbf16>
    %c0_12 = arith.constant 0 : index
    %c0_13 = arith.constant 0 : index
    %15 = vector.load %arg11[%c0_12, %c0_13] : memref<128x128xbf16, #tpu.memory_space<vmem>>, vector<128x128xbf16>
    tpu.vector_store %arg11[%c0_12, %c0_13], %14 {strides = array<i32>} : memref<128x128xbf16, #tpu.memory_space<vmem>>, vector<128x128xbf16>,
    %c0_14 = arith.constant 0 : index
    %c0_15 = arith.constant 0 : index
    %16 = vector.load %arg3[%c0_14, %c0_15] : memref<128x128xbf16, #tpu.memory_space<vmem>>, vector<128x128xbf16>
    %c0_16 = arith.constant 0 : index
    %c0_17 = arith.constant 0 : index
    %17 = vector.load %arg11[%c0_16, %c0_17] : memref<128x128xbf16, #tpu.memory_space<vmem>>, vector<128x128xbf16>
    %cst_18 = arith.constant dense<0.000000e+00> : vector<128x128xf32>
    %18 = tpu.matmul %16, %17, %cst_18 {dimension_numbers = #tpu.dot_dimension_numbers<[1], [0], [0], [1], [0, 0, 1, 1], [], []>} : vector<128x128xbf16>, vector<128x128xbf16>, vector<128x128xf32> -> vector<128x128xf32>
    %c128_i32 = arith.constant 128 : i32
    %19 = arith.muli %arg0, %c128_i32 : i32
    %20 = tpu.assume_multiple %19, 128 : i32
    %21 = arith.index_cast %20 : i32 to index
    %c0_19 = arith.constant 0 : index
    %22 = vector.load %arg11[%21, %c0_19] : memref<128x128xbf16, #tpu.memory_space<vmem>>, vector<128x128xbf16>
    %c0_20 = arith.constant 0 : index
    %c0_21 = arith.constant 0 : index
    %23 = vector.load %arg7[%c0_20, %c0_21] : memref<128x128xbf16, #tpu.memory_space<vmem>>, vector<128x128xbf16>
    %cst_22 = arith.constant dense<0.000000e+00> : vector<128x128xf32>
    %24 = tpu.matmul %22, %23, %cst_22 {dimension_numbers = #tpu.dot_dimension_numbers<[1], [0], [0], [1], [0, 0, 1, 1], [], []>} : vector<128x128xbf16>, vector<128x128xbf16>, vector<128x128xf32> -> vector<128x128xf32>
    %25 = arith.truncf %18 : vector<128x128xf32> to vector<128x128xbf16>
    %c0_23 = arith.constant 0 : index
    %c0_24 = arith.constant 0 : index
    %26 = vector.load %arg8[%c0_23, %c0_24] : memref<128x128xbf16, #tpu.memory_space<vmem>>, vector<128x128xbf16>
    %cst_25 = arith.constant dense<0.000000e+00> : vector<128x128xf32>
    %27 = tpu.matmul %25, %26, %cst_25 {dimension_numbers = #tpu.dot_dimension_numbers<[1], [0], [0], [1], [0, 0, 1, 1], [], []>} : vector<128x128xbf16>, vector<128x128xbf16>, vector<128x128xf32> -> vector<128x128xf32>
    %28 = arith.addf %24, %27 : vector<128x128xf32>
    %c0_26 = arith.constant 0 : index
    %c0_27 = arith.constant 0 : index
    %29 = vector.load %arg9[%c0_26, %c0_27] : memref<1x128xf32, #tpu.memory_space<vmem>>, vector<1x128xf32>
    %30 = vector.broadcast %29 : vector<1x128xf32> to vector<128x128xf32>
    %31 = arith.addf %28, %30 : vector<128x128xf32>
    %cst_28 = arith.constant dense<0xFF800000> : vector<128xf32>
    %32 = vector.multi_reduction <maximumf>, %31, %cst_28 [1] : vector<128x128xf32> to vector<128xf32>
    %33 = vector.shape_cast %32 : vector<128xf32> to vector<128x1xf32>
    %34 = vector.broadcast %33 : vector<128x1xf32> to vector<128x128xf32>
    %35 = arith.subf %31, %34 : vector<128x128xf32>
    %36 = math.exp %35 : vector<128x128xf32>
    %cst_29 = arith.constant dense<0.000000e+00> : vector<128xf32>
    %37 = vector.multi_reduction <add>, %36, %cst_29 [1] : vector<128x128xf32> to vector<128xf32>
    %38 = vector.shape_cast %37 : vector<128xf32> to vector<128x1xf32>
    %39 = math.log %38 : vector<128x1xf32>
    %40 = vector.broadcast %39 : vector<128x1xf32> to vector<128x128xf32>
    %41 = arith.subf %35, %40 : vector<128x128xf32>
    %c0_30 = arith.constant 0 : index
    %c0_31 = arith.constant 0 : index
    %42 = vector.load %arg10[%c0_30, %c0_31] : memref<128x128xf32, #tpu.memory_space<vmem>>, vector<128x128xf32>
    tpu.vector_store %arg10[%c0_30, %c0_31], %41 {strides = array<i32>} : memref<128x128xf32, #tpu.memory_space<vmem>>, vector<128x128xf32>,
    return
  }
  func.func @transform_0(%arg0: i32) -> (i32, i32) {
    %c0_i32 = arith.constant 0 : i32
    %c0_i32_0 = arith.constant 0 : i32
    %c0_i32_1 = arith.constant 0 : i32
    return %c0_i32, %c0_i32_0 : i32, i32
  }
  func.func @transform_1(%arg0: i32) -> (i32, i32) {
    %c0_i32 = arith.constant 0 : i32
    %c0_i32_0 = arith.constant 0 : i32
    %c0_i32_1 = arith.constant 0 : i32
    return %c0_i32, %c0_i32_0 : i32, i32
  }
  func.func @transform_2(%arg0: i32) -> (i32, i32) {
    %c0_i32 = arith.constant 0 : i32
    %c0_i32_0 = arith.constant 0 : i32
    return %arg0, %c0_i32 : i32, i32
  }
  func.func @transform_3(%arg0: i32) -> (i32, i32) {
    %c0_i32 = arith.constant 0 : i32
    %c0_i32_0 = arith.constant 0 : i32
    %c0_i32_1 = arith.constant 0 : i32
    return %c0_i32, %c0_i32_0 : i32, i32
  }
  func.func @transform_4(%arg0: i32) -> (i32, i32) {
    %c0_i32 = arith.constant 0 : i32
    %c0_i32_0 = arith.constant 0 : i32
    %c0_i32_1 = arith.constant 0 : i32
    return %c0_i32, %c0_i32_0 : i32, i32
  }
  func.func @transform_5(%arg0: i32) -> (i32, i32) {
    %c0_i32 = arith.constant 0 : i32
    %c0_i32_0 = arith.constant 0 : i32
    %c0_i32_1 = arith.constant 0 : i32
    return %c0_i32, %c0_i32_0 : i32, i32
  }
  func.func @transform_6(%arg0: i32) -> (i32, i32) {
    %c0_i32 = arith.constant 0 : i32
    %c0_i32_0 = arith.constant 0 : i32
    %c0_i32_1 = arith.constant 0 : i32
    return %c0_i32, %c0_i32_0 : i32, i32
  }
  func.func @transform_7(%arg0: i32) -> (i32, i32) {
    %c0_i32 = arith.constant 0 : i32
    %c0_i32_0 = arith.constant 0 : i32
    %c0_i32_1 = arith.constant 0 : i32
    return %c0_i32, %c0_i32_0 : i32, i32
  }
  func.func @transform_8(%arg0: i32) -> (i32, i32) {
    %c0_i32 = arith.constant 0 : i32
    %c0_i32_0 = arith.constant 0 : i32
    %c0_i32_1 = arith.constant 0 : i32
    return %c0_i32, %c0_i32_0 : i32, i32
  }
  func.func @transform_9(%arg0: i32) -> (i32, i32) {
    %c0_i32 = arith.constant 0 : i32
    %c0_i32_0 = arith.constant 0 : i32
    return %arg0, %c0_i32 : i32, i32
  }
}

</mosaic_0001>

<bundles_post_ra>
// kernel: tpu_custom_call.1
= control target key start
LH: loop header
LB: loop body
LE: loop exit
PB: predicated region body
PF: predicated region fallthrough
CT: control target
= control target key end

     0   :  { %14 = vsyncpa [#allocation4], 0  ;;  %s2703_s0 = inlined_call_operand.hbm [shape: bf16[128,128], index: 0, kind: input, shape index: {}]   ;;  %s2704_s1 = inlined_call_operand.hbm [shape: bf16[128,128], index: 1, kind: input, shape index: {}]   ;;  %s2705_s2 = inlined_call_operand.hbm [shape: bf16[128,128], index: 2, kind: input, shape index: {}]   ;;  %s2706_s3 = inlined_call_operand.hbm [shape: bf16[128,128], index: 3, kind: input, shape index: {}]   ;;  %s2707_s4 = inlined_call_operand.hbm [shape: bf16[128,128], index: 4, kind: input, shape index: {}]   ;;  %s2708_s5 = inlined_call_operand.vmem [shape: f32[1,128], index: 5, kind: input, shape index: {}]   ;;  %s2709_s6 = inlined_call_operand.hbm [shape: bf16[128,128], index: 6, kind: input, shape index: {}]   ;;  %s2710_s7 = inlined_call_operand.hbm [shape: bf16[128,128], index: 7, kind: input, shape index: {}]   ;;  %s2711_s8 = inlined_call_operand.vmem [shape: f32[1,128], index: 8, kind: input, shape index: {}]   ;;  %s2712_s9 = inlined_call_operand.hbm [shape: f32[128,128], index: 9, kind: output, shape index: {}]  }
   0x1   :  { %15 = vsyncpa [#allocation7], 0 }
   0x2   :  { %16 = vsyncpa [#allocation10], 0 }
   0x3   :  { %17 = vsyncpa [#allocation13], 0 }
   0x4   :  { %18 = vsyncpa [#allocation5], 0  ;;  %s2407_s30 = smov [#allocation6]   ;;  %s2408_s11 = smov [#allocation9]  }
   0x5   :  { %s36_s10 = sshll.u32 %s2407_s30, 4  ;;  %s60_s12 = sshll.u32 %s2408_s11, 4  ;;  %s37_s10 = int_to_ptr.vmem [resolvable:$true] %s36_s10  ;;  %s61_s12 = int_to_ptr.vmem [resolvable:$true] %s60_s12 }
   0x6   :  { %s2245_s13 = scalar_lea.vmem %s37_s10, 1024  ;;  %p2250_p1 = scmp.lt.s32.totalorder %s37_s10, %s37_s10 }
   0x7   :  { %p2246_p0 = scmp.ne.s32.totalorder %s37_s10, %s2245_s13  ;;  %p2251_p2 = scmp.lt.s32.totalorder %s2245_s13, %s2245_s13 }
   0x9   :  { %p2252_p3 = por %p2251_p2, %p2250_p1 }
   0xb   :  { %p2253_p4 = pnand %p2252_p3, %p2246_p0 }
   0xd   :  { %2256 = shalt.err (!%p2253_p4)
}
   0xe   :  { %s2409_s14 = smov 64   ;;  %s2410_s15 = smov 4  }
   0xf   :  { %42 = dma.hbm_to_vmem [thread:$0]  %s2704_s1, 1024, %s37_s10, [#allocation7], %s2409_s14, %s2409_s14, %s2410_s15  }
  0x10   :  { %s2265_s18 = scalar_lea.vmem %s61_s12, 1024  ;;  %p2270_p6 = scmp.lt.s32.totalorder %s61_s12, %s61_s12 }
  0x11   :  { %p2266_p5 = scmp.ne.s32.totalorder %s61_s12, %s2265_s18  ;;  %p2271_p7 = scmp.lt.s32.totalorder %s2265_s18, %s2265_s18 }
  0x13   :  { %p2272_p8 = por %p2271_p7, %p2270_p6 }
  0x15   :  { %p2273_p9 = pnand %p2272_p8, %p2266_p5 }
  0x17   :  { %2276 = shalt.err (!%p2273_p9)
}
  0x18   :  { %66 = dma.hbm_to_vmem [thread:$0]  %s2706_s3, 1024, %s61_s12, [#allocation10], %s2409_s14, %s2409_s14, %s2410_s15  }
  0x19   :  { %s2411_s21 = smov [#allocation12]   ;;  %s2412_s23 = smov [#allocation3]  }
  0x1a   :  { %s86_s22 = sshll.u32 %s2411_s21, 4  ;;  %s24_s24 = sshll.u32 %s2412_s23, 4  ;;  %s87_s22 = int_to_ptr.vmem [resolvable:$true] %s86_s22  ;;  %s25_s24 = int_to_ptr.vmem [resolvable:$true] %s24_s24 }
  0x1b   :  { %s2285_s1 = scalar_lea.vmem %s87_s22, 1024  ;;  %p2290_p11 = scmp.lt.s32.totalorder %s87_s22, %s87_s22 }
  0x1c   :  { %p2286_p10 = scmp.ne.s32.totalorder %s87_s22, %s2285_s1  ;;  %p2291_p12 = scmp.lt.s32.totalorder %s2285_s1, %s2285_s1 }
  0x1e   :  { %p2292_p13 = por %p2291_p12, %p2290_p11 }
  0x20   :  { %p2293_p0 = pnand %p2292_p13, %p2286_p10 }
  0x22   :  { %2296 = shalt.err (!%p2293_p0)
}
  0x23   :  { %92 = dma.hbm_to_vmem [thread:$0]  %s2709_s6, 1024, %s87_s22, [#allocation13], %s2409_s14, %s2409_s14, %s2410_s15  }
  0x24   :  { %s2305_s3 = scalar_lea.vmem %s25_s24, 1024  ;;  %p2310_p2 = scmp.lt.s32.totalorder %s25_s24, %s25_s24 }
  0x25   :  { %p2306_p1 = scmp.ne.s32.totalorder %s25_s24, %s2305_s3  ;;  %p2311_p3 = scmp.lt.s32.totalorder %s2305_s3, %s2305_s3 }
  0x27   :  { %p2312_p4 = por %p2311_p3, %p2310_p2 }
  0x29   :  { %p2313_p5 = pnand %p2312_p4, %p2306_p1 }
  0x2b   :  { %2316 = shalt.err (!%p2313_p5)
}
  0x2c   :  { %30 = dma.hbm_to_vmem [thread:$0]  %s2703_s0, 1024, %s25_s24, [#allocation4], %s2409_s14, %s2409_s14, %s2410_s15  }
  0x2d   :  { %s2413_s29 = smov [#allocation8]   ;;  %s2414_s10 = smov [#allocation11]  }
  0x2e   :  { %s48_s30 = sshll.u32 %s2413_s29, 4  ;;  %s72_s11 = sshll.u32 %s2414_s10, 4  ;;  %s49_s30 = int_to_ptr.vmem [resolvable:$true] %s48_s30  ;;  %s73_s11 = int_to_ptr.vmem [resolvable:$true] %s72_s11 }
  0x2f   :  { %s2325_s6 = scalar_lea.vmem %s49_s30, 1024  ;;  %p2330_p7 = scmp.lt.s32.totalorder %s49_s30, %s49_s30 }
  0x30   :  { %p2326_p6 = scmp.ne.s32.totalorder %s49_s30, %s2325_s6  ;;  %p2331_p8 = scmp.lt.s32.totalorder %s2325_s6, %s2325_s6 }
  0x32   :  { %p2332_p9 = por %p2331_p8, %p2330_p7 }
  0x34   :  { %p2333_p10 = pnand %p2332_p9, %p2326_p6 }
  0x36   :  { %2336 = shalt.err (!%p2333_p10)
}
  0x37   :  { %54 = dma.hbm_to_vmem [thread:$0]  %s2705_s2, 1024, %s49_s30, [#allocation7], %s2409_s14, %s2409_s14, %s2410_s15  }
  0x38   :  { %s2345_s0 = scalar_lea.vmem %s73_s11, 1024  ;;  %p2350_p12 = scmp.lt.s32.totalorder %s73_s11, %s73_s11 }
  0x39   :  { %p2346_p11 = scmp.ne.s32.totalorder %s73_s11, %s2345_s0  ;;  %p2351_p13 = scmp.lt.s32.totalorder %s2345_s0, %s2345_s0 }
  0x3b   :  { %p2352_p0 = por %p2351_p13, %p2350_p12 }
  0x3d   :  { %p2353_p1 = pnand %p2352_p0, %p2346_p11 }
  0x3f   :  { %2356 = shalt.err (!%p2353_p1)
}
  0x40   :  { %78 = dma.hbm_to_vmem [thread:$0]  %s2707_s4, 1024, %s73_s11, [#allocation10], %s2409_s14, %s2409_s14, %s2410_s15  }
  0x41   :  { %s2415_s18 = smov [#allocation14]  }
  0x42   :  { %s98_s19 = sshll.u32 %s2415_s18, 4  ;;  %s99_s19 = int_to_ptr.vmem [resolvable:$true] %s98_s19 }
  0x43   :  { %s2365_s20 = scalar_lea.vmem %s99_s19, 1024  ;;  %p2370_p3 = scmp.lt.s32.totalorder %s99_s19, %s99_s19 }
  0x44   :  { %p2366_p2 = scmp.ne.s32.totalorder %s99_s19, %s2365_s20  ;;  %p2371_p4 = scmp.lt.s32.totalorder %s2365_s20, %s2365_s20 }
  0x46   :  { %p2372_p5 = por %p2371_p4, %p2370_p3 }
  0x48   :  { %p2373_p6 = pnand %p2372_p5, %p2366_p2 }
  0x4a   :  { %2376 = shalt.err (!%p2373_p6)
}
  0x4b   :  { %104 = dma.hbm_to_vmem [thread:$0]  %s2710_s7, 1024, %s99_s19, [#allocation13], %s2409_s14, %s2409_s14, %s2410_s15  }
  0x4c   :  { %2397 = dma.done.wait [#allocation4], 1024  }
  0x4d   :  { %2398 = vsyncadd [#allocation4], 4294966272 }
  0x4e   :  { %2399 = dma.done.wait [#allocation7], 2048  }
  0x4f   :  { %2400 = vsyncadd [#allocation7], 4294965248 }
  0x50   :  { %2401 = dma.done.wait [#allocation10], 2048  }
  0x51   :  { %2402 = vsyncadd [#allocation10], 4294965248 }
  0x52   :  { %2403 = dma.done.wait [#allocation13], 2048  }
  0x53   :  { %2404 = vsyncadd [#allocation13], 4294965248  ;;  %v2511_v0 = vld [vmem:[#allocation3 + $0x38] sm:$0xff]   ;;  %v2513_v1 = vld [vmem:[#allocation3 + $0x30] sm:$0xff]  }
  0x54   :  { %1897 = vmatprep.subr.bf16.mxu0 %v2511_v0  ;;  %v2518_v2 = vld [vmem:[#allocation3 + $0x28] sm:$0xff]   ;;  %v2521_v3 = vld [vmem:[#allocation3 + $0x20] sm:$0xff]   ;;  %v2526_v5 = vld [vmem:[#allocation3 + $0x18] sm:$0xff]  }
  0x55   :  { %1898 = vmatpush3.bf16.msra.mxu0 %v2511_v0  ;;  %v2109_v4 = vld [vmem:[#allocation6] sm:$0xff]   ;;  %v2530_v6 = vld [vmem:[#allocation3 + $0x10] sm:$0xff]   ;;  %v2119_v7 = vld [vmem:[#allocation11 + $0x38] sm:$0xff]  }
  0x56   :  { %1899 = vmatprep.subr.bf16.mxu0 %v2513_v1  ;;  %1913 = vmatprep.mubr.bf16.mxu0 %v2109_v4  ;;  %v2533_v8 = vld [vmem:[#allocation3 + $0x8] sm:$0xff]   ;;  %v2121_v9 = vld [vmem:[#allocation11 + $0x30] sm:$0xff]   ;;  %v2108_v11 = vld [vmem:[#allocation3] sm:$0xff]  }
  0x57   :  { %1929 = vmatprep.subr.bf16.mxu1 %v2119_v7  ;;  %v2123_v10 = vld [vmem:[#allocation11 + $0x28] sm:$0xff]   ;;  %v2125_v12 = vld [vmem:[#allocation11 + $0x20] sm:$0xff]   ;;  %v2117_v13 = vld [vmem:[#allocation9 + $0x38] sm:$0xff]  }
  0x58   :  { %1930 = vmatpush3.bf16.msra.mxu1 %v2119_v7  ;;  %v2110_v14 = vld [vmem:[#allocation6 + $0x8] sm:$0xff]   ;;  %v2127_v15 = vld [vmem:[#allocation11 + $0x18] sm:$0xff]   ;;  %v2111_v16 = vld [vmem:[#allocation6 + $0x10] sm:$0xff]  }
  0x59   :  { %1900 = vmatpush3.bf16.msra.mxu0 %v2513_v1  ;;  %1931 = vmatprep.subr.bf16.mxu1 %v2121_v9  ;;  %v2118_v17 = vld [vmem:[#allocation9 + $0x30] sm:$0xff]   ;;  %v2120_v19 = vld [vmem:[#allocation9 + $0x28] sm:$0xff]   ;;  %v2112_v20 = vld [vmem:[#allocation6 + $0x18] sm:$0xff]  }
  0x5a   :  { %1901 = vmatprep.subr.bf16.mxu0 %v2518_v2  ;;  %v2129_v18 = vld [vmem:[#allocation11 + $0x10] sm:$0xff]   ;;  %v2113_v21 = vld [vmem:[#allocation6 + $0x20] sm:$0xff]   ;;  %v2124_v23 = vld [vmem:[#allocation9 + $0x18] sm:$0xff]  }
  0x5b   :  { %v2122_v22 = vld [vmem:[#allocation9 + $0x20] sm:$0xff]   ;;  %v2114_v24 = vld [vmem:[#allocation6 + $0x28] sm:$0xff]   ;;  %v2115_v25 = vld [vmem:[#allocation6 + $0x30] sm:$0xff]  }
  0x5c   :  { %1932 = vmatpush3.bf16.msra.mxu1 %v2121_v9  ;;  %v2126_v26 = vld [vmem:[#allocation9 + $0x10] sm:$0xff]   ;;  %v2128_v27 = vld [vmem:[#allocation9 + $0x8] sm:$0xff]   ;;  %v2116_v28 = vld [vmem:[#allocation6 + $0x38] sm:$0xff]  }
  0x5d   :  { %1902 = vmatpush3.bf16.msra.mxu0 %v2518_v2  ;;  %1933 = vmatprep.subr.bf16.mxu1 %v2123_v10  ;;  %v2130_v29 = vld [vmem:[#allocation9] sm:$0xff]   ;;  %v2131_v30 = vld [vmem:[#allocation11 + $0x8] sm:$0xff]  }
  0x5e   :  { %1903 = vmatprep.subr.bf16.mxu0 %v2521_v3  ;;  %v2132_v31 = vld [vmem:[#allocation11] sm:$0xff]  }
  0x5f   :  { %v2141_v56 = vld [vmem:[#allocation8] sm:$0xff]  }
  0x60   :  { %1934 = vmatpush3.bf16.msra.mxu1 %v2123_v10 }
  0x61   :  { %1904 = vmatpush3.bf16.msra.mxu0 %v2521_v3  ;;  %1935 = vmatprep.subr.bf16.mxu1 %v2125_v12 }
  0x62   :  { %1905 = vmatprep.subr.bf16.mxu0 %v2526_v5 }
  0x64   :  { %1936 = vmatpush3.bf16.msra.mxu1 %v2125_v12  ;;  %v2165_v12 = vld [vmem:[#allocation14 + $0x38] sm:$0xff]  }
  0x65   :  { %1906 = vmatpush3.bf16.msra.mxu0 %v2526_v5  ;;  %1937 = vmatprep.subr.bf16.mxu1 %v2127_v15 }
  0x66   :  { %1907 = vmatprep.subr.bf16.mxu0 %v2530_v6 }
  0x68   :  { %1938 = vmatpush3.bf16.msra.mxu1 %v2127_v15 }
  0x69   :  { %1908 = vmatpush3.bf16.msra.mxu0 %v2530_v6  ;;  %1939 = vmatprep.subr.bf16.mxu1 %v2129_v18 }
  0x6a   :  { %1909 = vmatprep.subr.bf16.mxu0 %v2533_v8 }
  0x6c   :  { %1940 = vmatpush3.bf16.msra.mxu1 %v2129_v18 }
  0x6d   :  { %1910 = vmatpush3.bf16.msra.mxu0 %v2533_v8  ;;  %1941 = vmatprep.subr.bf16.mxu1 %v2131_v30 }
  0x6e   :  { %1911 = vmatprep.subr.bf16.mxu0 %v2108_v11 }
  0x70   :  { %1942 = vmatpush3.bf16.msra.mxu1 %v2131_v30 }
  0x71   :  { %1912 = vmatpush3.bf16.msra.mxu0 %v2108_v11  ;;  %1943 = vmatprep.subr.bf16.mxu1 %v2132_v31 }
  0x72   :  { %1961 = vmatprep.subr.bf16.mxu0 %v2117_v13 }
  0x74   :  { %1914 = vmatmul.mubr.bf16.vlgmr.msra.gmra.mxu0 %v2110_v14  ;;  %1944 = vmatpush3.bf16.msra.mxu1 %v2132_v31 }
  0x75   :  { %1917 = vmatprep.mubr.bf16.mxu0 %v2111_v16  ;;  %1962 = vmatpush3.bf16.msra.mxu0 %v2117_v13  ;;  %v2166_v13 = vld [vmem:[#allocation14 + $0x30] sm:$0xff]  }
  0x76   :  { %1963 = vmatprep.subr.bf16.mxu0 %v2118_v17 }
  0x79   :  { %1964 = vmatpush3.bf16.msra.mxu0 %v2118_v17 }
  0x7a   :  { %1965 = vmatprep.subr.bf16.mxu0 %v2120_v19 }
  0x7c   :  { %1918 = vmatmul.mubr.bf16.gmra.mxu0 %v2112_v20 }
  0x7d   :  { %1921 = vmatprep.mubr.bf16.mxu0 %v2113_v21  ;;  %1966 = vmatpush3.bf16.msra.mxu0 %v2120_v19 }
  0x7e   :  { %1967 = vmatprep.subr.bf16.mxu0 %v2122_v22 }
  0x81   :  { %1968 = vmatpush3.bf16.msra.mxu0 %v2122_v22 }
  0x82   :  { %1969 = vmatprep.subr.bf16.mxu0 %v2124_v23 }
  0x84   :  { %1922 = vmatmul.mubr.bf16.gmra.mxu0 %v2114_v24  ;;  %v2167_v24 = vld [vmem:[#allocation14 + $0x28] sm:$0xff]  }
  0x85   :  { %1925 = vmatprep.mubr.bf16.mxu0 %v2115_v25  ;;  %1970 = vmatpush3.bf16.msra.mxu0 %v2124_v23 }
  0x86   :  { %1971 = vmatprep.subr.bf16.mxu0 %v2126_v26 }
  0x89   :  { %1972 = vmatpush3.bf16.msra.mxu0 %v2126_v26 }
  0x8a   :  { %1973 = vmatprep.subr.bf16.mxu0 %v2128_v27 }
  0x8c   :  { %1926 = vmatmul.mubr.bf16.gmra.mxu0 %v2116_v28 }
  0x8d   :  { %1974 = vmatpush3.bf16.msra.mxu0 %v2128_v27  ;;  %1977 = vmatprep.mubr.bf16.mxu0 %v2108_v11 }
  0x8e   :  { %1975 = vmatprep.subr.bf16.mxu0 %v2130_v29 }
  0x91   :  { %1976 = vmatpush3.bf16.msra.mxu0 %v2130_v29 }
  0x92   :  { %2025 = vmatprep.subr.bf16.mxu0 %v2165_v12 }
  0x94   :  { %1978 = vmatmul.mubr.bf16.vlgmr.msra.gmra.mxu0 %v2533_v8 }
  0x95   :  { %1981 = vmatprep.mubr.bf16.mxu0 %v2530_v6  ;;  %2026 = vmatpush3.bf16.msra.mxu0 %v2165_v12 }
  0x96   :  { %2027 = vmatprep.subr.bf16.mxu0 %v2166_v13 }
  0x99   :  { %2028 = vmatpush3.bf16.msra.mxu0 %v2166_v13 }
  0x9a   :  { %2029 = vmatprep.subr.bf16.mxu0 %v2167_v24 }
  0x9c   :  { %1982 = vmatmul.mubr.bf16.gmra.mxu0 %v2526_v5 }
  0x9d   :  { %1985 = vmatprep.mubr.bf16.mxu0 %v2521_v3  ;;  %v2549_v3 = vld [vmem:[%s2708_s5] ss:$0 sm:$0xff]  ;;  %2030 = vmatpush3.bf16.msra.mxu0 %v2167_v24 }
  0xa4   :  { %1986 = vmatmul.mubr.bf16.gmra.mxu0 %v2518_v2 }
  0xa5   :  { %1989 = vmatprep.mubr.bf16.mxu0 %v2513_v1 }
  0xac   :  { %1990 = vmatmul.mubr.bf16.gmra.mxu0 %v2511_v0 }
 0x134   :  { %v1915_v32 = vpop.f32.mrf.mxu0 }
 0x136   :  { %v291_v33 = vpop.f32.mrf.mxu0 }
 0x138   :  { %v1916_v34 = vpop.f32.mrf.mxu0 }
 0x139   :  { %v371_v37 = vpack.c.bf16 %v1916_v34, %v1915_v32 }
 0x13a   :  { %v294_v35 = vpop.f32.mrf.mxu0 }
 0x13b   :  { %v370_v36 = vpack.c.bf16 %v294_v35, %v291_v33  ;;  %v2168_v35 = vld [vmem:[#allocation14 + $0x20] sm:$0xff]  }
 0x13c   :  { %v1919_v38 = vpop.f32.mrf.mxu0  ;;  %2031 = vmatprep.subr.bf16.mxu0 %v2168_v35 }
 0x13d   :  { %1945 = vmatprep.mubr.bf16.mxu1 %v370_v36  ;;  %2032 = vmatpush3.bf16.msra.mxu0 %v2168_v35  ;;  %v2144_v35 = vld [vmem:[#allocation12 + $0x30] sm:$0xff]  }
 0x13e   :  { %v307_v39 = vpop.f32.mrf.mxu0  ;;  %1946 = vmatmul.mubr.bf16.vlgmr.msra.gmra.mxu1 %v371_v37 }
 0x140   :  { %v1920_v40 = vpop.f32.mrf.mxu0 }
 0x141   :  { %v373_v43 = vpack.c.bf16 %v1920_v40, %v1919_v38 }
 0x142   :  { %v310_v41 = vpop.f32.mrf.mxu0 }
 0x143   :  { %v372_v42 = vpack.c.bf16 %v310_v41, %v307_v39 }
 0x144   :  { %v1923_v44 = vpop.f32.mrf.mxu0 }
 0x145   :  { %1949 = vmatprep.mubr.bf16.mxu1 %v372_v42 }
 0x146   :  { %v323_v45 = vpop.f32.mrf.mxu0  ;;  %1950 = vmatmul.mubr.bf16.gmra.mxu1 %v373_v43 }
 0x148   :  { %v1924_v46 = vpop.f32.mrf.mxu0 }
 0x149   :  { %v375_v49 = vpack.c.bf16 %v1924_v46, %v1923_v44  ;;  %v2169_v46 = vld [vmem:[#allocation14 + $0x18] sm:$0xff]  }
 0x14a   :  { %v326_v47 = vpop.f32.mrf.mxu0  ;;  %2033 = vmatprep.subr.bf16.mxu0 %v2169_v46 }
 0x14b   :  { %v374_v48 = vpack.c.bf16 %v326_v47, %v323_v45  ;;  %2034 = vmatpush3.bf16.msra.mxu0 %v2169_v46  ;;  %v2157_v46 = vld [vmem:[#allocation12] sm:$0xff]  }
 0x14c   :  { %v1927_v50 = vpop.f32.mrf.mxu0 }
 0x14d   :  { %1953 = vmatprep.mubr.bf16.mxu1 %v374_v48 }
 0x14e   :  { %v339_v51 = vpop.f32.mrf.mxu0  ;;  %1954 = vmatmul.mubr.bf16.gmra.mxu1 %v375_v49 }
 0x150   :  { %v1928_v52 = vpop.f32.mrf.mxu0 }
 0x151   :  { %v377_v55 = vpack.c.bf16 %v1928_v52, %v1927_v50 }
 0x152   :  { %v342_v53 = vpop.f32.mrf.mxu0 }
 0x153   :  { %v376_v54 = vpack.c.bf16 %v342_v53, %v339_v51 }
 0x154   :  { %v1979_v57 = vpop.f32.mrf.mxu0 }
 0x155   :  { %1957 = vmatprep.mubr.bf16.mxu1 %v376_v54 }
 0x156   :  { %1958 = vmatmul.mubr.bf16.gmra.mxu1 %v377_v55  ;;  %v621_v58 = vpop.f32.mrf.mxu0 }
 0x157   :  { %2009 = vmatprep.mubr.bf16.mxu1 %v2141_v56 }
 0x158   :  { %v1980_v59 = vpop.f32.mrf.mxu0 }
 0x15a   :  { %v624_v60 = vpop.f32.mrf.mxu0 }
 0x15c   :  { %v1983_v61 = vpop.f32.mrf.mxu0 }
 0x15e   :  { %v637_v62 = vpop.f32.mrf.mxu0 }
 0x160   :  { %v1984_v63 = vpop.f32.mrf.mxu0 }
 0x162   :  { %v640_v0 = vpop.f32.mrf.mxu0 }
 0x164   :  { %v1987_v5 = vpop.f32.mrf.mxu0 }
 0x166   :  { %v653_v11 = vpop.f32.mrf.mxu0 }
 0x168   :  { %v1988_v23 = vpop.f32.mrf.mxu0 }
 0x16a   :  { %v656_v34 = vpop.f32.mrf.mxu0 }
 0x16c   :  { %v1991_v45 = vpop.f32.mrf.mxu0 }
 0x16e   :  { %v669_v55 = vpop.f32.mrf.mxu0 }
 0x1fe   :  { %v1947_v1 = vpop.f32.mrf.mxu1 }
 0x1ff   :  { %v630_v2 = vadd.f32 %v1979_v57, %v1947_v1  ;;  %v2170_v57 = vld [vmem:[#allocation14 + $0x10] sm:$0xff]  }
 0x200   :  { %v476_v4 = vpop.f32.mrf.mxu1  ;;  %2035 = vmatprep.subr.bf16.mxu0 %v2170_v57 }
 0x201   :  { %v622_v6 = vadd.f32 %v621_v58, %v476_v4  ;;  %v693_v8 = vadd.f32 %v2549_v3, %v630_v2  ;;  %v1992_v2 = vpop.f32.mrf.mxu0  ;;  %2036 = vmatpush3.bf16.msra.mxu0 %v2170_v57 }
 0x202   :  { %v1948_v7 = vpop.f32.mrf.mxu1 }
 0x203   :  { %v633_v9 = vadd.f32 %v1980_v59, %v1948_v7  ;;  %v691_v14 = vadd.f32 %v2549_v3, %v622_v6  ;;  %v709_v18 = vmax.f32 %v693_v8, 0.0  ;;  %v672_v13 = vpop.f32.mrf.mxu0 }
 0x204   :  { %v479_v10 = vpop.f32.mrf.mxu1 }
 0x205   :  { %v694_v15 = vadd.f32 %v2549_v3, %v633_v9  ;;  %v625_v16 = vadd.f32 %v624_v60, %v479_v10  ;;  %v707_v25 = vmax.f32 %v691_v14, 0.0 }
 0x206   :  { %v1951_v17 = vpop.f32.mrf.mxu1 }
 0x207   :  { %v710_v19 = vmax.f32 %v694_v15, 0.0  ;;  %v692_v20 = vadd.f32 %v2549_v3, %v625_v16  ;;  %v646_v21 = vadd.f32 %v1983_v61, %v1951_v17 }
 0x208   :  { %v492_v22 = vpop.f32.mrf.mxu1 }
 0x209   :  { %v1762_v26 = vpack.c.bf16 %v710_v19, %v709_v18  ;;  %v708_v27 = vmax.f32 %v692_v20, 0.0  ;;  %v638_v28 = vadd.f32 %v637_v62, %v492_v22  ;;  %v697_v31 = vadd.f32 %v2549_v3, %v646_v21 }
 0x20a   :  { %v1952_v29 = vpop.f32.mrf.mxu1 }
 0x20b   :  { %1794 = vst [vmem:[#allocation2 + $0x8] sm:$0xff] %v1762_v26   ;;  %v1757_v30 = vpack.c.bf16 %v708_v27, %v707_v25  ;;  %v649_v32 = vadd.f32 %v1984_v63, %v1952_v29  ;;  %v695_v36 = vadd.f32 %v2549_v3, %v638_v28  ;;  %v713_v40 = vmax.f32 %v697_v31, 0.0 }
 0x20c   :  { %v495_v33 = vpop.f32.mrf.mxu1 }
 0x20d   :  { %1758 = vst [vmem:[#allocation2] sm:$0xff] %v1757_v30   ;;  %v698_v37 = vadd.f32 %v2549_v3, %v649_v32  ;;  %v641_v38 = vadd.f32 %v640_v0, %v495_v33  ;;  %v711_v47 = vmax.f32 %v695_v36, 0.0  ;;  %v2143_v32 = vld [vmem:[#allocation12 + $0x38] sm:$0xff]   ;;  %v2142_v33 = vld [vmem:[#allocation8 + $0x8] sm:$0xff]  }
 0x20e   :  { %v1955_v39 = vpop.f32.mrf.mxu1  ;;  %v2147_v36 = vld [vmem:[#allocation12 + $0x28] sm:$0xff]  }
 0x20f   :  { %v714_v41 = vmax.f32 %v698_v37, 0.0  ;;  %v696_v42 = vadd.f32 %v2549_v3, %v641_v38  ;;  %v662_v43 = vadd.f32 %v1987_v5, %v1955_v39  ;;  %v2146_v37 = vld [vmem:[#allocation8 + $0x18] sm:$0xff]   ;;  %v2149_v38 = vld [vmem:[#allocation8 + $0x20] sm:$0xff]  }
 0x210   :  { %v508_v44 = vpop.f32.mrf.mxu1  ;;  %v2148_v39 = vld [vmem:[#allocation12 + $0x20] sm:$0xff]  }
 0x211   :  { %v1772_v48 = vpack.c.bf16 %v714_v41, %v713_v40  ;;  %v712_v49 = vmax.f32 %v696_v42, 0.0  ;;  %v654_v50 = vadd.f32 %v653_v11, %v508_v44  ;;  %v701_v53 = vadd.f32 %v2549_v3, %v662_v43  ;;  %v2151_v40 = vld [vmem:[#allocation12 + $0x18] sm:$0xff]   ;;  %v2150_v41 = vld [vmem:[#allocation8 + $0x28] sm:$0xff]   ;;  %v2153_v42 = vld [vmem:[#allocation8 + $0x30] sm:$0xff]  }
 0x212   :  { %v1956_v51 = vpop.f32.mrf.mxu1  ;;  %v2139_v30 = vld [vmem:[#allocation2 + $0x8] sm:$0xff]   ;;  %v2152_v43 = vld [vmem:[#allocation12 + $0x10] sm:$0xff]  }
 0x213   :  { %1796 = vst [vmem:[#allocation2 + $0x18] sm:$0xff] %v1772_v48   ;;  %v1767_v52 = vpack.c.bf16 %v712_v49, %v711_v47  ;;  %v665_v54 = vadd.f32 %v1988_v23, %v1956_v51  ;;  %v699_v58 = vadd.f32 %v2549_v3, %v654_v50  ;;  %v717_v62 = vmax.f32 %v701_v53, 0.0  ;;  %v2155_v44 = vld [vmem:[#allocation12 + $0x8] sm:$0xff]  }
 0x214   :  { %v511_v56 = vpop.f32.mrf.mxu1  ;;  %v2140_v31 = vld [vmem:[#allocation2] sm:$0xff]   ;;  %v2158_v48 = vld [vmem:[#allocation2 + $0x8] sm:$0xff]  }
 0x215   :  { %1795 = vst [vmem:[#allocation2 + $0x10] sm:$0xff] %v1767_v52   ;;  %v702_v59 = vadd.f32 %v2549_v3, %v665_v54  ;;  %v657_v60 = vadd.f32 %v656_v34, %v511_v56  ;;  %v715_v5 = vmax.f32 %v699_v58, 0.0  ;;  %v2145_v34 = vld [vmem:[#allocation8 + $0x10] sm:$0xff]   ;;  %v2156_v47 = vld [vmem:[#allocation2] sm:$0xff]  }
 0x216   :  { %v1959_v61 = vpop.f32.mrf.mxu1  ;;  %v2172_v56 = vld [vmem:[#allocation14] sm:$0xff]  }
 0x217   :  { %v718_v63 = vmax.f32 %v702_v59, 0.0  ;;  %v700_v0 = vadd.f32 %v2549_v3, %v657_v60  ;;  %v678_v1 = vadd.f32 %v1991_v45, %v1959_v61  ;;  %v2154_v45 = vld [vmem:[#allocation8 + $0x38] sm:$0xff]  }
 0x218   :  { %v524_v4 = vpop.f32.mrf.mxu1 }
 0x219   :  { %v1782_v6 = vpack.c.bf16 %v718_v63, %v717_v62  ;;  %v716_v7 = vmax.f32 %v700_v0, 0.0  ;;  %v670_v8 = vadd.f32 %v669_v55, %v524_v4  ;;  %v705_v11 = vadd.f32 %v2549_v3, %v678_v1  ;;  %v2171_v55 = vld [vmem:[#allocation14 + $0x8] sm:$0xff]  }
 0x21a   :  { %v1960_v9 = vpop.f32.mrf.mxu1  ;;  %v2137_v29 = vld [vmem:[#allocation2 + $0x18] sm:$0xff]   ;;  %2037 = vmatprep.subr.bf16.mxu0 %v2171_v55 }
 0x21b   :  { %1798 = vst [vmem:[#allocation2 + $0x28] sm:$0xff] %v1782_v6   ;;  %v1777_v10 = vpack.c.bf16 %v716_v7, %v715_v5  ;;  %v681_v12 = vadd.f32 %v1992_v2, %v1960_v9  ;;  %v703_v15 = vadd.f32 %v2549_v3, %v670_v8  ;;  %v721_v18 = vmax.f32 %v705_v11, 0.0  ;;  %v2160_v50 = vld [vmem:[#allocation2 + $0x18] sm:$0xff]   ;;  %2038 = vmatpush3.bf16.msra.mxu0 %v2171_v55 }
 0x21c   :  { %v527_v14 = vpop.f32.mrf.mxu1  ;;  %v2159_v49 = vld [vmem:[#allocation2 + $0x10] sm:$0xff]   ;;  %2039 = vmatprep.subr.bf16.mxu0 %v2172_v56 }
 0x21d   :  { %1797 = vst [vmem:[#allocation2 + $0x20] sm:$0xff] %v1777_v10   ;;  %v706_v16 = vadd.f32 %v2549_v3, %v681_v12  ;;  %v673_v17 = vadd.f32 %v672_v13, %v527_v14  ;;  %v719_v21 = vmax.f32 %v703_v15, 0.0 }
 0x21f   :  { %v722_v19 = vmax.f32 %v706_v16, 0.0  ;;  %v704_v20 = vadd.f32 %v2549_v3, %v673_v17  ;;  %v2138_v3 = vld [vmem:[#allocation2 + $0x10] sm:$0xff]   ;;  %2040 = vmatpush3.bf16.msra.mxu0 %v2172_v56 }
 0x221   :  { %v1792_v22 = vpack.c.bf16 %v722_v19, %v721_v18  ;;  %v720_v23 = vmax.f32 %v704_v20, 0.0 }
 0x222   :  { %v2135_v27 = vld [vmem:[#allocation2 + $0x28] sm:$0xff]  }
 0x223   :  { %1800 = vst [vmem:[#allocation2 + $0x38] sm:$0xff] %v1792_v22   ;;  %v1787_v24 = vpack.c.bf16 %v720_v23, %v719_v21  ;;  %v2162_v52 = vld [vmem:[#allocation2 + $0x28] sm:$0xff]  }
 0x224   :  { %v2136_v28 = vld [vmem:[#allocation2 + $0x20] sm:$0xff]  }
 0x225   :  { %1799 = vst [vmem:[#allocation2 + $0x30] sm:$0xff] %v1787_v24   ;;  %v2161_v51 = vld [vmem:[#allocation2 + $0x20] sm:$0xff]  }
 0x22a   :  { %v2133_v25 = vld [vmem:[#allocation2 + $0x38] sm:$0xff]  }
 0x22b   :  { %1993 = vmatprep.subr.bf16.mxu1 %v2133_v25  ;;  %v2164_v54 = vld [vmem:[#allocation2 + $0x38] sm:$0xff]  }
 0x22c   :  { %v2134_v26 = vld [vmem:[#allocation2 + $0x30] sm:$0xff]   ;;  %1994 = vmatpush3.bf16.msra.mxu1 %v2133_v25 }
 0x22d   :  { %1995 = vmatprep.subr.bf16.mxu1 %v2134_v26  ;;  %v2163_v53 = vld [vmem:[#allocation2 + $0x30] sm:$0xff]  }
 0x230   :  { %1996 = vmatpush3.bf16.msra.mxu1 %v2134_v26 }
 0x231   :  { %1997 = vmatprep.subr.bf16.mxu1 %v2135_v27 }
 0x234   :  { %1998 = vmatpush3.bf16.msra.mxu1 %v2135_v27  ;;  %v2570_v27 = vld [vmem:[%s2711_s8] ss:$0 sm:$0xff]  ;;  %s2416_s8 = smov [#allocation15]  }
 0x235   :  { %1999 = vmatprep.subr.bf16.mxu1 %v2136_v28  ;;  %s1631_s15 = sshll.u32 %s2416_s8, 4  ;;  %s1632_s15 = int_to_ptr.vmem [resolvable:$true] %s1631_s15 }
 0x236   :  { %s2377_s22 = scalar_lea.vmem %s1632_s15, 2048  ;;  %p2382_p8 = scmp.lt.s32.totalorder %s1632_s15, %s1632_s15 }
 0x237   :  { %p2378_p7 = scmp.ne.s32.totalorder %s1632_s15, %s2377_s22  ;;  %p2383_p9 = scmp.lt.s32.totalorder %s2377_s22, %s2377_s22 }
 0x238   :  { %2000 = vmatpush3.bf16.msra.mxu1 %v2136_v28 }
 0x239   :  { %2001 = vmatprep.subr.bf16.mxu1 %v2137_v29  ;;  %p2384_p10 = por %p2383_p9, %p2382_p8 }
 0x23b   :  { %p2385_p11 = pnand %p2384_p10, %p2378_p7 }
 0x23c   :  { %2002 = vmatpush3.bf16.msra.mxu1 %v2137_v29 }
 0x23d   :  { %2003 = vmatprep.subr.bf16.mxu1 %v2138_v3 }
 0x240   :  { %2004 = vmatpush3.bf16.msra.mxu1 %v2138_v3 }
 0x241   :  { %2005 = vmatprep.subr.bf16.mxu1 %v2139_v30 }
 0x244   :  { %2006 = vmatpush3.bf16.msra.mxu1 %v2139_v30 }
 0x245   :  { %2007 = vmatprep.subr.bf16.mxu1 %v2140_v31 }
 0x248   :  { %2008 = vmatpush3.bf16.msra.mxu1 %v2140_v31 }
 0x249   :  { %2057 = vmatprep.subr.bf16.mxu1 %v2143_v32 }
 0x24b   :  { %2010 = vmatmul.mubr.bf16.vlgmr.msra.gmra.mxu1 %v2142_v33 }
 0x24c   :  { %2058 = vmatpush3.bf16.msra.mxu1 %v2143_v32  ;;  %2013 = vmatprep.mubr.bf16.mxu1 %v2145_v34 }
 0x24d   :  { %2059 = vmatprep.subr.bf16.mxu1 %v2144_v35 }
 0x250   :  { %2060 = vmatpush3.bf16.msra.mxu1 %v2144_v35 }
 0x251   :  { %2061 = vmatprep.subr.bf16.mxu1 %v2147_v36 }
 0x253   :  { %2014 = vmatmul.mubr.bf16.gmra.mxu1 %v2146_v37 }
 0x254   :  { %2062 = vmatpush3.bf16.msra.mxu1 %v2147_v36  ;;  %2017 = vmatprep.mubr.bf16.mxu1 %v2149_v38 }
 0x255   :  { %2063 = vmatprep.subr.bf16.mxu1 %v2148_v39 }
 0x258   :  { %2064 = vmatpush3.bf16.msra.mxu1 %v2148_v39 }
 0x259   :  { %2065 = vmatprep.subr.bf16.mxu1 %v2151_v40 }
 0x25b   :  { %2018 = vmatmul.mubr.bf16.gmra.mxu1 %v2150_v41 }
 0x25c   :  { %2066 = vmatpush3.bf16.msra.mxu1 %v2151_v40  ;;  %2021 = vmatprep.mubr.bf16.mxu1 %v2153_v42 }
 0x25d   :  { %2067 = vmatprep.subr.bf16.mxu1 %v2152_v43 }
 0x260   :  { %2068 = vmatpush3.bf16.msra.mxu1 %v2152_v43 }
 0x261   :  { %2069 = vmatprep.subr.bf16.mxu1 %v2155_v44 }
 0x263   :  { %2022 = vmatmul.mubr.bf16.gmra.mxu1 %v2154_v45 }
 0x264   :  { %2070 = vmatpush3.bf16.msra.mxu1 %v2155_v44  ;;  %2073 = vmatprep.mubr.bf16.mxu1 %v2156_v47 }
 0x265   :  { %2071 = vmatprep.subr.bf16.mxu1 %v2157_v46 }
 0x268   :  { %2072 = vmatpush3.bf16.msra.mxu1 %v2157_v46 }
 0x26b   :  { %2074 = vmatmul.mubr.bf16.vlgmr.msra.gmra.mxu1 %v2158_v48 }
 0x26c   :  { %2077 = vmatprep.mubr.bf16.mxu1 %v2159_v49 }
 0x273   :  { %2078 = vmatmul.mubr.bf16.gmra.mxu1 %v2160_v50 }
 0x274   :  { %2081 = vmatprep.mubr.bf16.mxu1 %v2161_v51 }
 0x27b   :  { %2082 = vmatmul.mubr.bf16.gmra.mxu1 %v2162_v52 }
 0x27c   :  { %2085 = vmatprep.mubr.bf16.mxu1 %v2163_v53 }
 0x283   :  { %2086 = vmatmul.mubr.bf16.gmra.mxu1 %v2164_v54 }
 0x30b   :  { %v2011_v57 = vpop.f32.mrf.mxu1 }
 0x30d   :  { %v965_v58 = vpop.f32.mrf.mxu1 }
 0x30f   :  { %v2012_v59 = vpop.f32.mrf.mxu1 }
 0x310   :  { %v1066_v62 = vpack.c.bf16 %v2012_v59, %v2011_v57 }
 0x311   :  { %v968_v60 = vpop.f32.mrf.mxu1 }
 0x312   :  { %v1065_v61 = vpack.c.bf16 %v968_v60, %v965_v58 }
 0x313   :  { %v2015_v63 = vpop.f32.mrf.mxu1 }
 0x314   :  { %2041 = vmatprep.mubr.bf16.mxu0 %v1065_v61 }
 0x315   :  { %v981_v0 = vpop.f32.mrf.mxu1  ;;  %2042 = vmatmul.mubr.bf16.vlgmr.msra.gmra.mxu0 %v1066_v62 }
 0x317   :  { %v2016_v1 = vpop.f32.mrf.mxu1 }
 0x318   :  { %v1068_v5 = vpack.c.bf16 %v2016_v1, %v2015_v63 }
 0x319   :  { %v984_v2 = vpop.f32.mrf.mxu1 }
 0x31a   :  { %v1067_v4 = vpack.c.bf16 %v984_v2, %v981_v0 }
 0x31b   :  { %v2019_v6 = vpop.f32.mrf.mxu1 }
 0x31c   :  { %2045 = vmatprep.mubr.bf16.mxu0 %v1067_v4 }
 0x31d   :  { %v997_v7 = vpop.f32.mrf.mxu1  ;;  %2046 = vmatmul.mubr.bf16.gmra.mxu0 %v1068_v5 }
 0x31f   :  { %v2020_v8 = vpop.f32.mrf.mxu1 }
 0x320   :  { %v1070_v11 = vpack.c.bf16 %v2020_v8, %v2019_v6 }
 0x321   :  { %v1000_v9 = vpop.f32.mrf.mxu1 }
 0x322   :  { %v1069_v10 = vpack.c.bf16 %v1000_v9, %v997_v7 }
 0x323   :  { %v2023_v12 = vpop.f32.mrf.mxu1 }
 0x324   :  { %2049 = vmatprep.mubr.bf16.mxu0 %v1069_v10 }
 0x325   :  { %v1013_v13 = vpop.f32.mrf.mxu1  ;;  %2050 = vmatmul.mubr.bf16.gmra.mxu0 %v1070_v11 }
 0x327   :  { %v2024_v14 = vpop.f32.mrf.mxu1 }
 0x328   :  { %v1072_v17 = vpack.c.bf16 %v2024_v14, %v2023_v12 }
 0x329   :  { %v1016_v15 = vpop.f32.mrf.mxu1 }
 0x32a   :  { %v1071_v16 = vpack.c.bf16 %v1016_v15, %v1013_v13 }
 0x32b   :  { %v2075_v18 = vpop.f32.mrf.mxu1 }
 0x32c   :  { %2053 = vmatprep.mubr.bf16.mxu0 %v1071_v16 }
 0x32d   :  { %2054 = vmatmul.mubr.bf16.gmra.mxu0 %v1072_v17  ;;  %v1364_v19 = vpop.f32.mrf.mxu1 }
 0x32f   :  { %v2076_v20 = vpop.f32.mrf.mxu1 }
 0x331   :  { %v1367_v21 = vpop.f32.mrf.mxu1 }
 0x333   :  { %v2079_v22 = vpop.f32.mrf.mxu1 }
 0x335   :  { %v1380_v23 = vpop.f32.mrf.mxu1 }
 0x337   :  { %v2080_v24 = vpop.f32.mrf.mxu1 }
 0x339   :  { %v1383_v25 = vpop.f32.mrf.mxu1 }
 0x33b   :  { %v2083_v29 = vpop.f32.mrf.mxu1 }
 0x33d   :  { %v1396_v35 = vpop.f32.mrf.mxu1 }
 0x33f   :  { %v2084_v42 = vpop.f32.mrf.mxu1 }
 0x341   :  { %v1399_v48 = vpop.f32.mrf.mxu1 }
 0x343   :  { %v2087_v55 = vpop.f32.mrf.mxu1 }
 0x345   :  { %v1412_v62 = vpop.f32.mrf.mxu1 }
 0x347   :  { %v2088_v5 = vpop.f32.mrf.mxu1 }
 0x349   :  { %v1415_v12 = vpop.f32.mrf.mxu1 }
 0x3d5   :  { %v2043_v26 = vpop.f32.mrf.mxu0 }
 0x3d6   :  { %v1373_v28 = vadd.f32 %v2075_v18, %v2043_v26 }
 0x3d7   :  { %v1171_v3 = vpop.f32.mrf.mxu0 }
 0x3d8   :  { %v1365_v30 = vadd.f32 %v1364_v19, %v1171_v3  ;;  %v2573_v31 = vadd.f32 %v2570_v27, %v1373_v28 }
 0x3d9   :  { %v2044_v32 = vpop.f32.mrf.mxu0 }
 0x3da   :  { %v1376_v33 = vadd.f32 %v2076_v20, %v2044_v32  ;;  %1454 = vmax.xlane.f32.xlu1 %v2573_v31  ;;  %v2577_v34 = vadd.f32 %v2570_v27, %v1365_v30 }
 0x3db   :  { %v1174_v36 = vpop.f32.mrf.mxu0 }
 0x3dc   :  { %v1368_v37 = vadd.f32 %v1367_v21, %v1174_v36  ;;  %1450 = vmax.xlane.f32.xlu0 %v2577_v34  ;;  %v2581_v38 = vadd.f32 %v2570_v27, %v1376_v33 }
 0x3dd   :  { %v2047_v39 = vpop.f32.mrf.mxu0 }
 0x3de   :  { %v1389_v40 = vadd.f32 %v2079_v22, %v2047_v39  ;;  %1456 = vmax.xlane.f32.xlu1 %v2581_v38  ;;  %v2585_v41 = vadd.f32 %v2570_v27, %v1368_v37 }
 0x3df   :  { %v1187_v43 = vpop.f32.mrf.mxu0 }
 0x3e0   :  { %1452 = vmax.xlane.f32.xlu0 %v2585_v41  ;;  %v1381_v45 = vadd.f32 %v1380_v23, %v1187_v43  ;;  %v2589_v47 = vadd.f32 %v2570_v27, %v1389_v40 }
 0x3e1   :  { %v2048_v44 = vpop.f32.mrf.mxu0 }
 0x3e2   :  { %v1392_v46 = vadd.f32 %v2080_v24, %v2048_v44  ;;  %v1438_v54 = vadd.f32 %v2570_v27, %v1381_v45 }
 0x3e3   :  { %v1190_v49 = vpop.f32.mrf.mxu0 }
 0x3e4   :  { %v1384_v50 = vadd.f32 %v1383_v25, %v1190_v49  ;;  %1462 = vmax.xlane.f32.xlu0 %v2589_v47  ;;  %v1441_v51 = vadd.f32 %v2570_v27, %v1392_v46 }
 0x3e5   :  { %v2051_v52 = vpop.f32.mrf.mxu0 }
 0x3e6   :  { %v1405_v53 = vadd.f32 %v2083_v29, %v2051_v52  ;;  %1464 = vmax.xlane.f32.xlu1 %v1441_v51  ;;  %v1439_v57 = vadd.f32 %v2570_v27, %v1384_v50 }
 0x3e7   :  { %v1203_v56 = vpop.f32.mrf.mxu0 }
 0x3e8   :  { %1458 = vmax.xlane.f32.xlu0 %v1438_v54  ;;  %v1397_v59 = vadd.f32 %v1396_v35, %v1203_v56  ;;  %v1444_v61 = vadd.f32 %v2570_v27, %v1405_v53 }
 0x3e9   :  { %v2052_v58 = vpop.f32.mrf.mxu0 }
 0x3ea   :  { %v1408_v60 = vadd.f32 %v2084_v42, %v2052_v58  ;;  %1460 = vmax.xlane.f32.xlu1 %v1439_v57  ;;  %v2601_v4 = vadd.f32 %v2570_v27, %v1397_v59 }
 0x3eb   :  { %v1206_v63 = vpop.f32.mrf.mxu0 }
 0x3ec   :  { %v1400_v0 = vadd.f32 %v1399_v48, %v1206_v63  ;;  %1470 = vmax.xlane.f32.xlu0 %v1444_v61  ;;  %v2597_v1 = vadd.f32 %v2570_v27, %v1408_v60 }
 0x3ed   :  { %v2055_v2 = vpop.f32.mrf.mxu0 }
 0x3ee   :  { %1472 = vmax.xlane.f32.xlu1 %v2597_v1  ;;  %v2605_v8 = vadd.f32 %v2570_v27, %v1400_v0  ;;  %v1421_v10 = vadd.f32 %v2087_v55, %v2055_v2 }
 0x3ef   :  { %v1219_v6 = vpop.f32.mrf.mxu0 }
 0x3f0   :  { %v1413_v7 = vadd.f32 %v1412_v62, %v1219_v6  ;;  %1466 = vmax.xlane.f32.xlu0 %v2601_v4  ;;  %v2613_v16 = vadd.f32 %v2570_v27, %v1421_v10 }
 0x3f1   :  { %v2056_v9 = vpop.f32.mrf.mxu0 }
 0x3f2   :  { %1468 = vmax.xlane.f32.xlu1 %v2605_v8  ;;  %v2609_v11 = vadd.f32 %v2570_v27, %v1413_v7  ;;  %v1424_v15 = vadd.f32 %v2088_v5, %v2056_v9 }
 0x3f3   :  { %v1222_v13 = vpop.f32.mrf.mxu0 }
 0x3f4   :  { %v1416_v14 = vadd.f32 %v1415_v12, %v1222_v13  ;;  %1474 = vmax.xlane.f32.xlu0 %v2609_v11  ;;  %v2621_v18 = vadd.f32 %v2570_v27, %v1424_v15 }
 0x3f6   :  { %v2616_v17 = vadd.f32 %v2570_v27, %v1416_v14 }
 0x3f8   :  { %1478 = vmax.xlane.f32.xlu0 %v2613_v16  ;;  %1476 = vmax.xlane.f32.xlu1 %v2616_v17 }
 0x3fc   :  { %1480 = vmax.xlane.f32.xlu1 %v2621_v18 }
 0x463   :  { %v1455_v19 = vpop.xlane.xlu1 %1454 }
 0x464   :  { %v2625_v20 = vsub.f32 %v2573_v31, %v1455_v19 }
 0x465   :  { %v1451_v21 = vpop.xlane.xlu0 %1450 }
 0x466   :  { %v1502_v22 = vmul.f32 1.442695, %v2625_v20  ;;  %v2629_v23 = vsub.f32 %v2577_v34, %v1451_v21 }
 0x467   :  { %v1457_v24 = vpop.xlane.xlu1 %1456 }
 0x468   :  { %2173 = vpow2.f32 %v1502_v22  ;;  %v1498_v25 = vmul.f32 1.442695, %v2629_v23  ;;  %v2633_v26 = vsub.f32 %v2581_v38, %v1457_v24 }
 0x469   :  { %v1453_v27 = vpop.xlane.xlu0 %1452 }
 0x46a   :  { %v1504_v28 = vmul.f32 1.442695, %v2633_v26  ;;  %v2637_v29 = vsub.f32 %v2585_v41, %v1453_v27  ;;  %2175 = vpow2.f32 %v1498_v25 }
 0x46c   :  { %2177 = vpow2.f32 %v1504_v28  ;;  %v1500_v3 = vmul.f32 1.442695, %v2637_v29 }
 0x46d   :  { %v1463_v30 = vpop.xlane.xlu0 %1462 }
 0x46e   :  { %v2641_v31 = vsub.f32 %v2589_v47, %v1463_v30  ;;  %2179 = vpow2.f32 %v1500_v3 }
 0x46f   :  { %v1465_v32 = vpop.xlane.xlu1 %1464 }
 0x470   :  { %v1510_v33 = vmul.f32 1.442695, %v2641_v31  ;;  %v2644_v34 = vsub.f32 %v1441_v51, %v1465_v32 }
 0x471   :  { %v1459_v35 = vpop.xlane.xlu0 %1458 }
 0x472   :  { %2181 = vpow2.f32 %v1510_v33  ;;  %v1512_v36 = vmul.f32 1.442695, %v2644_v34  ;;  %v2647_v37 = vsub.f32 %v1438_v54, %v1459_v35 }
 0x473   :  { %v1461_v38 = vpop.xlane.xlu1 %1460 }
 0x474   :  { %2183 = vpow2.f32 %v1512_v36  ;;  %v1506_v39 = vmul.f32 1.442695, %v2647_v37  ;;  %v2650_v40 = vsub.f32 %v1439_v57, %v1461_v38 }
 0x475   :  { %v2174_v41 = vpop.eup %2173  ;;  %v1471_v42 = vpop.xlane.xlu0 %1470 }
 0x476   :  { %2185 = vpow2.f32 %v1506_v39  ;;  %v1508_v43 = vmul.f32 1.442695, %v2650_v40  ;;  %v2653_v44 = vsub.f32 %v1444_v61, %v1471_v42  ;;  %1534 = vadd.xlane.f32.xlu0 %v2174_v41 }
 0x477   :  { %v1473_v45 = vpop.xlane.xlu1 %1472  ;;  %v2176_v46 = vpop.eup %2175 }
 0x478   :  { %2187 = vpow2.f32 %v1508_v43  ;;  %v1518_v47 = vmul.f32 1.442695, %v2653_v44  ;;  %v2657_v48 = vsub.f32 %v2597_v1, %v1473_v45 }
 0x479   :  { %v2178_v49 = vpop.eup %2177  ;;  %v1467_v50 = vpop.xlane.xlu0 %1466 }
 0x47a   :  { %2189 = vpow2.f32 %v1518_v47  ;;  %v1520_v51 = vmul.f32 1.442695, %v2657_v48  ;;  %v2661_v52 = vsub.f32 %v2601_v4, %v1467_v50  ;;  %1530 = vadd.xlane.f32.xlu0 %v2176_v46  ;;  %1536 = vadd.xlane.f32.xlu1 %v2178_v49 }
 0x47b   :  { %v1469_v53 = vpop.xlane.xlu1 %1468  ;;  %v2180_v56 = vpop.eup %2179 }
 0x47c   :  { %2191 = vpow2.f32 %v1520_v51  ;;  %v1514_v54 = vmul.f32 1.442695, %v2661_v52  ;;  %v2665_v55 = vsub.f32 %v2605_v8, %v1469_v53 }
 0x47d   :  { %v1475_v57 = vpop.xlane.xlu0 %1474 }
 0x47e   :  { %2193 = vpow2.f32 %v1514_v54  ;;  %v1516_v58 = vmul.f32 1.442695, %v2665_v55  ;;  %v2669_v59 = vsub.f32 %v2609_v11, %v1475_v57  ;;  %1532 = vadd.xlane.f32.xlu1 %v2180_v56 }
 0x47f   :  { %v2182_v60 = vpop.eup %2181 }
 0x480   :  { %2195 = vpow2.f32 %v1516_v58  ;;  %v1522_v61 = vmul.f32 1.442695, %v2669_v59  ;;  %1542 = vadd.xlane.f32.xlu0 %v2182_v60 }
 0x481   :  { %v2184_v62 = vpop.eup %2183  ;;  %v1479_v63 = vpop.xlane.xlu0 %1478 }
 0x482   :  { %v1477_v0 = vpop.xlane.xlu1 %1476  ;;  %2197 = vpow2.f32 %v1522_v61  ;;  %v2673_v1 = vsub.f32 %v2613_v16, %v1479_v63  ;;  %1544 = vadd.xlane.f32.xlu1 %v2184_v62 }
 0x483   :  { %v2676_v2 = vsub.f32 %v2616_v17, %v1477_v0  ;;  %v2186_v4 = vpop.eup %2185 }
 0x484   :  { %v1526_v5 = vmul.f32 1.442695, %v2673_v1  ;;  %1538 = vadd.xlane.f32.xlu0 %v2186_v4 }
 0x485   :  { %v1524_v6 = vmul.f32 1.442695, %v2676_v2  ;;  %v2188_v7 = vpop.eup %2187 }
 0x486   :  { %v1481_v8 = vpop.xlane.xlu1 %1480  ;;  %2199 = vpow2.f32 %v1526_v5  ;;  %1540 = vadd.xlane.f32.xlu1 %v2188_v7 }
 0x487   :  { %v2681_v9 = vsub.f32 %v2621_v18, %v1481_v8  ;;  %v2190_v10 = vpop.eup %2189  ;;  %2201 = vpow2.f32 %v1524_v6 }
 0x488   :  { %1550 = vadd.xlane.f32.xlu0 %v2190_v10 }
 0x489   :  { %v1528_v11 = vmul.f32 1.442695, %v2681_v9  ;;  %v2192_v12 = vpop.eup %2191 }
 0x48a   :  { %1552 = vadd.xlane.f32.xlu1 %v2192_v12 }
 0x48b   :  { %2203 = vpow2.f32 %v1528_v11  ;;  %v2194_v13 = vpop.eup %2193 }
 0x48c   :  { %1546 = vadd.xlane.f32.xlu0 %v2194_v13 }
 0x48d   :  { %v2196_v14 = vpop.eup %2195 }
 0x48e   :  { %1548 = vadd.xlane.f32.xlu1 %v2196_v14 }
 0x48f   :  { %v2198_v15 = vpop.eup %2197 }
 0x490   :  { %1554 = vadd.xlane.f32.xlu0 %v2198_v15 }
 0x493   :  { %v2200_v16 = vpop.eup %2199 }
 0x494   :  { %v2202_v17 = vpop.eup %2201  ;;  %1558 = vadd.xlane.f32.xlu0 %v2200_v16 }
 0x495   :  { %1556 = vadd.xlane.f32.xlu1 %v2202_v17 }
 0x498   :  { %v2204_v18 = vpop.eup %2203 }
 0x499   :  { %1560 = vadd.xlane.f32.xlu1 %v2204_v18 }
 0x4ff   :  { %v1535_v19 = vpop.xlane.xlu0 %1534 }
 0x500   :  { %2205 = vlog2.f32 %v1535_v19 }
 0x503   :  { %v1531_v21 = vpop.xlane.xlu0 %1530  ;;  %v1537_v22 = vpop.xlane.xlu1 %1536 }
 0x504   :  { %2207 = vlog2.f32 %v1531_v21 }
 0x505   :  { %2209 = vlog2.f32 %v1537_v22 }
 0x507   :  { %v1533_v24 = vpop.xlane.xlu1 %1532 }
 0x508   :  { %2211 = vlog2.f32 %v1533_v24 }
 0x509   :  { %v1543_v25 = vpop.xlane.xlu0 %1542 }
 0x50a   :  { %2213 = vlog2.f32 %v1543_v25 }
 0x50b   :  { %v1545_v27 = vpop.xlane.xlu1 %1544 }
 0x50c   :  { %2215 = vlog2.f32 %v1545_v27 }
 0x50d   :  { %v2206_v28 = vpop.eup %2205  ;;  %v1539_v3 = vpop.xlane.xlu0 %1538 }
 0x50e   :  { %v1567_v30 = vmul.f32 0.6931472, %v2206_v28  ;;  %2217 = vlog2.f32 %v1539_v3 }
 0x50f   :  { %v1541_v32 = vpop.xlane.xlu1 %1540 }
 0x510   :  { %v1596_v33 = vsub.f32 %v2625_v20, %v1567_v30  ;;  %2219 = vlog2.f32 %v1541_v32 }
 0x511   :  { %v2208_v35 = vpop.eup %2207  ;;  %v1551_v36 = vpop.xlane.xlu0 %1550 }
 0x512   :  { %v2210_v38 = vpop.eup %2209  ;;  %1612 = vst [vmem:[#allocation15 + $0x10] sm:$0xff] %v1596_v33  ;;  %v1563_v39 = vmul.f32 0.6931472, %v2208_v35  ;;  %2221 = vlog2.f32 %v1551_v36 }
 0x513   :  { %v1569_v41 = vmul.f32 0.6931472, %v2210_v38  ;;  %v1553_v42 = vpop.xlane.xlu1 %1552 }
 0x514   :  { %v1594_v43 = vsub.f32 %v2629_v23, %v1563_v39  ;;  %2223 = vlog2.f32 %v1553_v42 }
 0x515   :  { %v2212_v45 = vpop.eup %2211  ;;  %v1597_v46 = vsub.f32 %v2633_v26, %v1569_v41  ;;  %v1547_v47 = vpop.xlane.xlu0 %1546 }
 0x516   :  { %1610 = vst [vmem:[#allocation15] sm:$0xff] %v1594_v43  ;;  %v1565_v49 = vmul.f32 0.6931472, %v2212_v45  ;;  %2225 = vlog2.f32 %v1547_v47 }
 0x517   :  { %v2214_v20 = vpop.eup %2213  ;;  %1613 = vst [vmem:[#allocation15 + $0x18] sm:$0xff] %v1597_v46  ;;  %v1549_v50 = vpop.xlane.xlu1 %1548 }
 0x518   :  { %v1595_v51 = vsub.f32 %v2637_v29, %v1565_v49  ;;  %v1575_v53 = vmul.f32 0.6931472, %v2214_v20  ;;  %2227 = vlog2.f32 %v1549_v50 }
 0x519   :  { %v2216_v54 = vpop.eup %2215  ;;  %v1555_v56 = vpop.xlane.xlu0 %1554 }
 0x51a   :  { %1611 = vst [vmem:[#allocation15 + $0x8] sm:$0xff] %v1595_v51  ;;  %v1600_v23 = vsub.f32 %v2641_v31, %v1575_v53  ;;  %v1577_v57 = vmul.f32 0.6931472, %v2216_v54  ;;  %2229 = vlog2.f32 %v1555_v56 }
 0x51b   :  { %v2218_v58 = vpop.eup %2217 }
 0x51c   :  { %1616 = vst [vmem:[#allocation15 + $0x30] sm:$0xff] %v1600_v23  ;;  %v1601_v26 = vsub.f32 %v2644_v34, %v1577_v57  ;;  %v1571_v60 = vmul.f32 0.6931472, %v2218_v58 }
 0x51d   :  { %v2220_v61 = vpop.eup %2219  ;;  %v1559_v62 = vpop.xlane.xlu0 %1558 }
 0x51e   :  { %1617 = vst [vmem:[#allocation15 + $0x38] sm:$0xff] %v1601_v26  ;;  %v1598_v63 = vsub.f32 %v2647_v37, %v1571_v60  ;;  %v1573_v29 = vmul.f32 0.6931472, %v2220_v61  ;;  %2231 = vlog2.f32 %v1559_v62  ;;  %v1557_v0 = vpop.xlane.xlu1 %1556 }
 0x51f   :  { %v2222_v4 = vpop.eup %2221  ;;  %2233 = vlog2.f32 %v1557_v0 }
 0x520   :  { %1614 = vst [vmem:[#allocation15 + $0x20] sm:$0xff] %v1598_v63  ;;  %v1599_v31 = vsub.f32 %v2650_v40, %v1573_v29  ;;  %v1583_v5 = vmul.f32 0.6931472, %v2222_v4 }
 0x521   :  { %v2224_v6 = vpop.eup %2223 }
 0x522   :  { %1615 = vst [vmem:[#allocation15 + $0x28] sm:$0xff] %v1599_v31  ;;  %v1604_v7 = vsub.f32 %v2653_v44, %v1583_v5  ;;  %v1585_v34 = vmul.f32 0.6931472, %v2224_v6  ;;  %v1561_v8 = vpop.xlane.xlu1 %1560 }
 0x523   :  { %v2226_v10 = vpop.eup %2225  ;;  %2235 = vlog2.f32 %v1561_v8 }
 0x524   :  { %1620 = vst [vmem:[#allocation15 + $0x50] sm:$0xff] %v1604_v7  ;;  %v1605_v37 = vsub.f32 %v2657_v48, %v1585_v34  ;;  %v1579_v11 = vmul.f32 0.6931472, %v2226_v10 }
 0x525   :  { %v2228_v12 = vpop.eup %2227 }
 0x526   :  { %1621 = vst [vmem:[#allocation15 + $0x58] sm:$0xff] %v1605_v37  ;;  %v1602_v13 = vsub.f32 %v2661_v52, %v1579_v11  ;;  %v1581_v14 = vmul.f32 0.6931472, %v2228_v12 }
 0x527   :  { %v2230_v15 = vpop.eup %2229 }
 0x528   :  { %1618 = vst [vmem:[#allocation15 + $0x40] sm:$0xff] %v1602_v13  ;;  %v1603_v40 = vsub.f32 %v2665_v55, %v1581_v14  ;;  %v1587_v16 = vmul.f32 0.6931472, %v2230_v15 }
 0x52a   :  { %1619 = vst [vmem:[#allocation15 + $0x48] sm:$0xff] %v1603_v40  ;;  %v1606_v44 = vsub.f32 %v2669_v59, %v1587_v16 }
 0x52b   :  { %v2232_v17 = vpop.eup %2231 }
 0x52c   :  { %v2234_v18 = vpop.eup %2233  ;;  %1622 = vst [vmem:[#allocation15 + $0x60] sm:$0xff] %v1606_v44  ;;  %v1591_v19 = vmul.f32 0.6931472, %v2232_v17 }
 0x52d   :  { %v1589_v21 = vmul.f32 0.6931472, %v2234_v18 }
 0x52e   :  { %v1608_v48 = vsub.f32 %v2673_v1, %v1591_v19 }
 0x52f   :  { %v1607_v22 = vsub.f32 %v2676_v2, %v1589_v21 }
 0x530   :  { %v2236_v52 = vpop.eup %2235  ;;  %1624 = vst [vmem:[#allocation15 + $0x70] sm:$0xff] %v1608_v48 }
 0x531   :  { %1623 = vst [vmem:[#allocation15 + $0x68] sm:$0xff] %v1607_v22  ;;  %v1593_v24 = vmul.f32 0.6931472, %v2236_v52 }
 0x533   :  { %v1609_v55 = vsub.f32 %v2681_v9, %v1593_v24 }
 0x535   :  { %1625 = vst [vmem:[#allocation15 + $0x78] sm:$0xff] %v1609_v55 }
 0x536   :  { %2388 = shalt.err (!%p2385_p11)
}
 0x537   :  { %s2417_s23 = smov 128   ;;  %s2418_s24 = smov 8  }
 0x538   :  { %1637 = dma.vmem_to_hbm [thread:$0]  %s1632_s15, 2048, %s2712_s9, [#allocation5], %s2417_s23, %s2417_s23, %s2418_s24  }
 0x539   :  { %2405 = dma.done.wait [#allocation5], 2048  }
 0x53a   :  { %2406 = vsyncadd [#allocation5], 4294965248 }
 0x53b   :  { %1641 = vsyncpa [#allocation4], 1 }
 0x53c   :  { %1642 = vsyncpa [#allocation7], 1 }
 0x53d   :  { %1643 = vsyncpa [#allocation10], 1 }
 0x53e   :  { %1644 = vsyncpa [#allocation13], 1 }
 0x53f   :  { %1645 = vsyncpa [#allocation5], 1 }

</bundles_post_ra>
